<compile_context>
chip_gen: v6e
topology: v6e:2x2x1
jax: 0.10.0
libtpu: 0.0.40
codegen_flags: <defaults>
</compile_context>

<pallas_src>
import jax
import jax.numpy as jnp
import numpy as np
from jax.experimental import pallas as pl
from jax.experimental.pallas import tpu as pltpu

DEGREE = 20  # matches `deg = 20` in the reference module (must be >= 1)


def legendre_kernel(w_ref, x_ref, o_ref):
    # w_ref: SMEM (DEGREE+1,) linear weights (the row of nn.Linear weight)
    # x_ref: VMEM (TR, TL) tile of the (flattened) input
    # o_ref: VMEM (TR, TL) tile of the output
    x = x_ref[...]

    # Clenshaw backward recurrence for S(x) = sum_{k=0..D} w_k P_k(x).
    # Legendre: P_{k+1} = [(2k+1)/(k+1)] x P_k - [k/(k+1)] P_{k-1}
    #   b_k = w_k + [(2k+1)/(k+1)] x b_{k+1} - [(k+1)/(k+2)] b_{k+2}
    #   S   = w_0 + x b_1 - 0.5 b_2
    # All recurrence coefficients are Python floats -> VPU multiplies by
    # immediates, no vector divides.
    b1 = jnp.full_like(x, w_ref[DEGREE])   # b_D  (b_{D+1} = b_{D+2} = 0)
    b2 = jnp.zeros_like(x)                 # b_{D+1}
    for k in range(DEGREE - 1, 0, -1):     # unrolled at trace time
        a_k = (2.0 * k + 1.0) / (k + 1.0)
        c_k = (k + 1.0) / (k + 2.0)
        b_new = w_ref[k] + a_k * (x * b1) - c_k * b2
        b2 = b1
        b1 = b_new
    s = w_ref[0] + x * b1 - 0.5 * b2

    # Boundary-condition factor applied just before the store (short live range).
    o_ref[...] = (s * (1.0 - x * x)).astype(o_ref.dtype)


def legendre_network_1d(x, w, *, lane=512, max_block_rows=256):
    """x: (B, N) float32, w: (DEGREE+1,) float32 -> (B, N) float32."""
    assert DEGREE >= 1
    B, N = x.shape
    total = B * N

    # Sublane/lane-dense slab: flatten, pad, reshape to (rows, lane) with
    # lane a multiple of 128 and block rows a multiple of 8.
    rows_needed = pl.cdiv(total, lane)
    block_rows = min(max_block_rows, max(8, pl.next_power_of_2(rows_needed)))
    rows = pl.cdiv(rows_needed, block_rows) * block_rows
    padded = rows * lane

    xf = jnp.ravel(x)
    if padded != total:
        xf = jnp.pad(xf, (0, padded - total))
    x2 = xf.reshape(rows, lane)

    out2 = pl.pallas_call(
        legendre_kernel,
        out_shape=jax.ShapeDtypeStruct((rows, lane), x.dtype),
        grid=(rows // block_rows,),
        in_specs=[
            pl.BlockSpec(memory_space=pltpu.MemorySpace.SMEM),        # weights
            pl.BlockSpec((block_rows, lane), lambda i: (i, 0)),       # x tile
        ],
        out_specs=pl.BlockSpec((block_rows, lane), lambda i: (i, 0)),
        compiler_params=pltpu.CompilerParams(
            dimension_semantics=("parallel",)),
    )(w, x2)

    return out2.reshape(-1)[:total].reshape(B, N)


if __name__ == "__main__":
    key = jax.random.PRNGKey(0)
    kx, kw = jax.random.split(key)

    B, N = 2, 256                     # (bsize, npts) — small demo shape
    x = jax.random.uniform(kx, (B, N), jnp.float32, minval=-1.0, maxval=1.0)

    # nn.Linear(DEGREE+1, 1, bias=False): weight shape (1, DEGREE+1),
    # default init U(-1/sqrt(fan_in), 1/sqrt(fan_in)) — done deterministically.
    bound = 1.0 / float(np.sqrt(DEGREE + 1))
    w = jax.random.uniform(kw, (DEGREE + 1,), jnp.float32, minval=-bound, maxval=bound)

    out = legendre_network_1d(x, w)
    jax.block_until_ready(out)
    assert out.shape == (B, N)

    # float64 reference (same math as the PyTorch forward:
    #   P_d(x) * (1 - x^2) @ W^T, forward Bonnet recurrence).
    xn = np.asarray(x, dtype=np.float64)
    wn = np.asarray(w, dtype=np.float64)
    p_prev = np.ones_like(xn)
    p_curr = xn.copy()
    ref = wn[0] * p_prev + wn[1] * p_curr
    for n in range(2, DEGREE + 1):
        p_next = ((2.0 * n - 1.0) * xn * p_curr - (n - 1.0) * p_prev) / n
        ref = ref + wn[n] * p_next
        p_prev, p_curr = p_curr, p_next
    ref = ref * (1.0 - xn ** 2)

    np.testing.assert_allclose(np.asarray(out, dtype=np.float64), ref,
                               rtol=1e-4, atol=1e-5)
    print("KERNEL_OK")
</pallas_src>

<mosaic_0001>
module attributes {stable_mosaic.version = 11 : i64} {
  func.func @legendre_kernel(%arg0: i32, %arg1: memref<21xf32, #tpu.memory_space<smem>>, %arg2: memref<8x512xf32, #tpu.memory_space<vmem>>, %arg3: memref<8x512xf32, #tpu.memory_space<vmem>>) attributes {dimension_semantics = [#tpu.dimension_semantics<parallel>], iteration_bounds = array<i64: 1>, scalar_prefetch = 0 : i64, scratch_operands = 0 : i64, tpu.core_type = #tpu.core_type<tc>, window_params = [{transform_indices = @transform_0, window_bounds = array<i64: 21>}, {transform_indices = @transform_1, window_bounds = array<i64: 8, 512>}, {transform_indices = @transform_2, window_bounds = array<i64: 8, 512>}]} {
    %c0 = arith.constant 0 : index
    %c0_0 = arith.constant 0 : index
    %0 = vector.load %arg2[%c0, %c0_0] : memref<8x512xf32, #tpu.memory_space<vmem>>, vector<8x512xf32>
    %c20 = arith.constant 20 : index
    %1 = memref.load %arg1[%c20] : memref<21xf32, #tpu.memory_space<smem>>
    %2 = vector.broadcast %1 : f32 to vector<8x512xf32>
    %cst = arith.constant 0.000000e+00 : f32
    %3 = vector.broadcast %cst : f32 to vector<8x512xf32>
    %c19 = arith.constant 19 : index
    %4 = memref.load %arg1[%c19] : memref<21xf32, #tpu.memory_space<smem>>
    %5 = arith.mulf %0, %2 : vector<8x512xf32>
    %cst_1 = arith.constant 1.950000e+00 : f32
    %6 = vector.broadcast %cst_1 : f32 to vector<8x512xf32>
    %7 = arith.mulf %6, %5 : vector<8x512xf32>
    %8 = vector.broadcast %4 : f32 to vector<8x512xf32>
    %9 = arith.addf %8, %7 : vector<8x512xf32>
    %cst_2 = arith.constant 0.952380955 : f32
    %10 = vector.broadcast %cst_2 : f32 to vector<8x512xf32>
    %11 = arith.mulf %10, %3 : vector<8x512xf32>
    %12 = arith.subf %9, %11 : vector<8x512xf32>
    %c18 = arith.constant 18 : index
    %13 = memref.load %arg1[%c18] : memref<21xf32, #tpu.memory_space<smem>>
    %14 = arith.mulf %0, %12 : vector<8x512xf32>
    %cst_3 = arith.constant 1.94736838 : f32
    %15 = vector.broadcast %cst_3 : f32 to vector<8x512xf32>
    %16 = arith.mulf %15, %14 : vector<8x512xf32>
    %17 = vector.broadcast %13 : f32 to vector<8x512xf32>
    %18 = arith.addf %17, %16 : vector<8x512xf32>
    %cst_4 = arith.constant 0.949999988 : f32
    %19 = vector.broadcast %cst_4 : f32 to vector<8x512xf32>
    %20 = arith.mulf %19, %2 : vector<8x512xf32>
    %21 = arith.subf %18, %20 : vector<8x512xf32>
    %c17 = arith.constant 17 : index
    %22 = memref.load %arg1[%c17] : memref<21xf32, #tpu.memory_space<smem>>
    %23 = arith.mulf %0, %21 : vector<8x512xf32>
    %cst_5 = arith.constant 1.94444442 : f32
    %24 = vector.broadcast %cst_5 : f32 to vector<8x512xf32>
    %25 = arith.mulf %24, %23 : vector<8x512xf32>
    %26 = vector.broadcast %22 : f32 to vector<8x512xf32>
    %27 = arith.addf %26, %25 : vector<8x512xf32>
    %cst_6 = arith.constant 0.947368443 : f32
    %28 = vector.broadcast %cst_6 : f32 to vector<8x512xf32>
    %29 = arith.mulf %28, %12 : vector<8x512xf32>
    %30 = arith.subf %27, %29 : vector<8x512xf32>
    %c16 = arith.constant 16 : index
    %31 = memref.load %arg1[%c16] : memref<21xf32, #tpu.memory_space<smem>>
    %32 = arith.mulf %0, %30 : vector<8x512xf32>
    %cst_7 = arith.constant 1.94117641 : f32
    %33 = vector.broadcast %cst_7 : f32 to vector<8x512xf32>
    %34 = arith.mulf %33, %32 : vector<8x512xf32>
    %35 = vector.broadcast %31 : f32 to vector<8x512xf32>
    %36 = arith.addf %35, %34 : vector<8x512xf32>
    %cst_8 = arith.constant 0.944444418 : f32
    %37 = vector.broadcast %cst_8 : f32 to vector<8x512xf32>
    %38 = arith.mulf %37, %21 : vector<8x512xf32>
    %39 = arith.subf %36, %38 : vector<8x512xf32>
    %c15 = arith.constant 15 : index
    %40 = memref.load %arg1[%c15] : memref<21xf32, #tpu.memory_space<smem>>
    %41 = arith.mulf %0, %39 : vector<8x512xf32>
    %cst_9 = arith.constant 1.937500e+00 : f32
    %42 = vector.broadcast %cst_9 : f32 to vector<8x512xf32>
    %43 = arith.mulf %42, %41 : vector<8x512xf32>
    %44 = vector.broadcast %40 : f32 to vector<8x512xf32>
    %45 = arith.addf %44, %43 : vector<8x512xf32>
    %cst_10 = arith.constant 0.941176474 : f32
    %46 = vector.broadcast %cst_10 : f32 to vector<8x512xf32>
    %47 = arith.mulf %46, %30 : vector<8x512xf32>
    %48 = arith.subf %45, %47 : vector<8x512xf32>
    %c14 = arith.constant 14 : index
    %49 = memref.load %arg1[%c14] : memref<21xf32, #tpu.memory_space<smem>>
    %50 = arith.mulf %0, %48 : vector<8x512xf32>
    %cst_11 = arith.constant 1.93333328 : f32
    %51 = vector.broadcast %cst_11 : f32 to vector<8x512xf32>
    %52 = arith.mulf %51, %50 : vector<8x512xf32>
    %53 = vector.broadcast %49 : f32 to vector<8x512xf32>
    %54 = arith.addf %53, %52 : vector<8x512xf32>
    %cst_12 = arith.constant 9.375000e-01 : f32
    %55 = vector.broadcast %cst_12 : f32 to vector<8x512xf32>
    %56 = arith.mulf %55, %39 : vector<8x512xf32>
    %57 = arith.subf %54, %56 : vector<8x512xf32>
    %c13 = arith.constant 13 : index
    %58 = memref.load %arg1[%c13] : memref<21xf32, #tpu.memory_space<smem>>
    %59 = arith.mulf %0, %57 : vector<8x512xf32>
    %cst_13 = arith.constant 1.92857146 : f32
    %60 = vector.broadcast %cst_13 : f32 to vector<8x512xf32>
    %61 = arith.mulf %60, %59 : vector<8x512xf32>
    %62 = vector.broadcast %58 : f32 to vector<8x512xf32>
    %63 = arith.addf %62, %61 : vector<8x512xf32>
    %cst_14 = arith.constant 0.933333337 : f32
    %64 = vector.broadcast %cst_14 : f32 to vector<8x512xf32>
    %65 = arith.mulf %64, %48 : vector<8x512xf32>
    %66 = arith.subf %63, %65 : vector<8x512xf32>
    %c12 = arith.constant 12 : index
    %67 = memref.load %arg1[%c12] : memref<21xf32, #tpu.memory_space<smem>>
    %68 = arith.mulf %0, %66 : vector<8x512xf32>
    %cst_15 = arith.constant 1.92307687 : f32
    %69 = vector.broadcast %cst_15 : f32 to vector<8x512xf32>
    %70 = arith.mulf %69, %68 : vector<8x512xf32>
    %71 = vector.broadcast %67 : f32 to vector<8x512xf32>
    %72 = arith.addf %71, %70 : vector<8x512xf32>
    %cst_16 = arith.constant 0.928571403 : f32
    %73 = vector.broadcast %cst_16 : f32 to vector<8x512xf32>
    %74 = arith.mulf %73, %57 : vector<8x512xf32>
    %75 = arith.subf %72, %74 : vector<8x512xf32>
    %c11 = arith.constant 11 : index
    %76 = memref.load %arg1[%c11] : memref<21xf32, #tpu.memory_space<smem>>
    %77 = arith.mulf %0, %75 : vector<8x512xf32>
    %cst_17 = arith.constant 1.91666663 : f32
    %78 = vector.broadcast %cst_17 : f32 to vector<8x512xf32>
    %79 = arith.mulf %78, %77 : vector<8x512xf32>
    %80 = vector.broadcast %76 : f32 to vector<8x512xf32>
    %81 = arith.addf %80, %79 : vector<8x512xf32>
    %cst_18 = arith.constant 0.923076927 : f32
    %82 = vector.broadcast %cst_18 : f32 to vector<8x512xf32>
    %83 = arith.mulf %82, %66 : vector<8x512xf32>
    %84 = arith.subf %81, %83 : vector<8x512xf32>
    %c10 = arith.constant 10 : index
    %85 = memref.load %arg1[%c10] : memref<21xf32, #tpu.memory_space<smem>>
    %86 = arith.mulf %0, %84 : vector<8x512xf32>
    %cst_19 = arith.constant 1.90909088 : f32
    %87 = vector.broadcast %cst_19 : f32 to vector<8x512xf32>
    %88 = arith.mulf %87, %86 : vector<8x512xf32>
    %89 = vector.broadcast %85 : f32 to vector<8x512xf32>
    %90 = arith.addf %89, %88 : vector<8x512xf32>
    %cst_20 = arith.constant 0.916666686 : f32
    %91 = vector.broadcast %cst_20 : f32 to vector<8x512xf32>
    %92 = arith.mulf %91, %75 : vector<8x512xf32>
    %93 = arith.subf %90, %92 : vector<8x512xf32>
    %c9 = arith.constant 9 : index
    %94 = memref.load %arg1[%c9] : memref<21xf32, #tpu.memory_space<smem>>
    %95 = arith.mulf %0, %93 : vector<8x512xf32>
    %cst_21 = arith.constant 1.900000e+00 : f32
    %96 = vector.broadcast %cst_21 : f32 to vector<8x512xf32>
    %97 = arith.mulf %96, %95 : vector<8x512xf32>
    %98 = vector.broadcast %94 : f32 to vector<8x512xf32>
    %99 = arith.addf %98, %97 : vector<8x512xf32>
    %cst_22 = arith.constant 0.909090936 : f32
    %100 = vector.broadcast %cst_22 : f32 to vector<8x512xf32>
    %101 = arith.mulf %100, %84 : vector<8x512xf32>
    %102 = arith.subf %99, %101 : vector<8x512xf32>
    %c8 = arith.constant 8 : index
    %103 = memref.load %arg1[%c8] : memref<21xf32, #tpu.memory_space<smem>>
    %104 = arith.mulf %0, %102 : vector<8x512xf32>
    %cst_23 = arith.constant 1.88888884 : f32
    %105 = vector.broadcast %cst_23 : f32 to vector<8x512xf32>
    %106 = arith.mulf %105, %104 : vector<8x512xf32>
    %107 = vector.broadcast %103 : f32 to vector<8x512xf32>
    %108 = arith.addf %107, %106 : vector<8x512xf32>
    %cst_24 = arith.constant 0.899999976 : f32
    %109 = vector.broadcast %cst_24 : f32 to vector<8x512xf32>
    %110 = arith.mulf %109, %93 : vector<8x512xf32>
    %111 = arith.subf %108, %110 : vector<8x512xf32>
    %c7 = arith.constant 7 : index
    %112 = memref.load %arg1[%c7] : memref<21xf32, #tpu.memory_space<smem>>
    %113 = arith.mulf %0, %111 : vector<8x512xf32>
    %cst_25 = arith.constant 1.875000e+00 : f32
    %114 = vector.broadcast %cst_25 : f32 to vector<8x512xf32>
    %115 = arith.mulf %114, %113 : vector<8x512xf32>
    %116 = vector.broadcast %112 : f32 to vector<8x512xf32>
    %117 = arith.addf %116, %115 : vector<8x512xf32>
    %cst_26 = arith.constant 0.888888895 : f32
    %118 = vector.broadcast %cst_26 : f32 to vector<8x512xf32>
    %119 = arith.mulf %118, %102 : vector<8x512xf32>
    %120 = arith.subf %117, %119 : vector<8x512xf32>
    %c6 = arith.constant 6 : index
    %121 = memref.load %arg1[%c6] : memref<21xf32, #tpu.memory_space<smem>>
    %122 = arith.mulf %0, %120 : vector<8x512xf32>
    %cst_27 = arith.constant 1.85714281 : f32
    %123 = vector.broadcast %cst_27 : f32 to vector<8x512xf32>
    %124 = arith.mulf %123, %122 : vector<8x512xf32>
    %125 = vector.broadcast %121 : f32 to vector<8x512xf32>
    %126 = arith.addf %125, %124 : vector<8x512xf32>
    %cst_28 = arith.constant 8.750000e-01 : f32
    %127 = vector.broadcast %cst_28 : f32 to vector<8x512xf32>
    %128 = arith.mulf %127, %111 : vector<8x512xf32>
    %129 = arith.subf %126, %128 : vector<8x512xf32>
    %c5 = arith.constant 5 : index
    %130 = memref.load %arg1[%c5] : memref<21xf32, #tpu.memory_space<smem>>
    %131 = arith.mulf %0, %129 : vector<8x512xf32>
    %cst_29 = arith.constant 1.83333337 : f32
    %132 = vector.broadcast %cst_29 : f32 to vector<8x512xf32>
    %133 = arith.mulf %132, %131 : vector<8x512xf32>
    %134 = vector.broadcast %130 : f32 to vector<8x512xf32>
    %135 = arith.addf %134, %133 : vector<8x512xf32>
    %cst_30 = arith.constant 0.857142865 : f32
    %136 = vector.broadcast %cst_30 : f32 to vector<8x512xf32>
    %137 = arith.mulf %136, %120 : vector<8x512xf32>
    %138 = arith.subf %135, %137 : vector<8x512xf32>
    %c4 = arith.constant 4 : index
    %139 = memref.load %arg1[%c4] : memref<21xf32, #tpu.memory_space<smem>>
    %140 = arith.mulf %0, %138 : vector<8x512xf32>
    %cst_31 = arith.constant 1.800000e+00 : f32
    %141 = vector.broadcast %cst_31 : f32 to vector<8x512xf32>
    %142 = arith.mulf %141, %140 : vector<8x512xf32>
    %143 = vector.broadcast %139 : f32 to vector<8x512xf32>
    %144 = arith.addf %143, %142 : vector<8x512xf32>
    %cst_32 = arith.constant 0.833333313 : f32
    %145 = vector.broadcast %cst_32 : f32 to vector<8x512xf32>
    %146 = arith.mulf %145, %129 : vector<8x512xf32>
    %147 = arith.subf %144, %146 : vector<8x512xf32>
    %c3 = arith.constant 3 : index
    %148 = memref.load %arg1[%c3] : memref<21xf32, #tpu.memory_space<smem>>
    %149 = arith.mulf %0, %147 : vector<8x512xf32>
    %cst_33 = arith.constant 1.750000e+00 : f32
    %150 = vector.broadcast %cst_33 : f32 to vector<8x512xf32>
    %151 = arith.mulf %150, %149 : vector<8x512xf32>
    %152 = vector.broadcast %148 : f32 to vector<8x512xf32>
    %153 = arith.addf %152, %151 : vector<8x512xf32>
    %cst_34 = arith.constant 8.000000e-01 : f32
    %154 = vector.broadcast %cst_34 : f32 to vector<8x512xf32>
    %155 = arith.mulf %154, %138 : vector<8x512xf32>
    %156 = arith.subf %153, %155 : vector<8x512xf32>
    %c2 = arith.constant 2 : index
    %157 = memref.load %arg1[%c2] : memref<21xf32, #tpu.memory_space<smem>>
    %158 = arith.mulf %0, %156 : vector<8x512xf32>
    %cst_35 = arith.constant 1.66666663 : f32
    %159 = vector.broadcast %cst_35 : f32 to vector<8x512xf32>
    %160 = arith.mulf %159, %158 : vector<8x512xf32>
    %161 = vector.broadcast %157 : f32 to vector<8x512xf32>
    %162 = arith.addf %161, %160 : vector<8x512xf32>
    %cst_36 = arith.constant 7.500000e-01 : f32
    %163 = vector.broadcast %cst_36 : f32 to vector<8x512xf32>
    %164 = arith.mulf %163, %147 : vector<8x512xf32>
    %165 = arith.subf %162, %164 : vector<8x512xf32>
    %c1 = arith.constant 1 : index
    %166 = memref.load %arg1[%c1] : memref<21xf32, #tpu.memory_space<smem>>
    %167 = arith.mulf %0, %165 : vector<8x512xf32>
    %cst_37 = arith.constant 1.500000e+00 : f32
    %168 = vector.broadcast %cst_37 : f32 to vector<8x512xf32>
    %169 = arith.mulf %168, %167 : vector<8x512xf32>
    %170 = vector.broadcast %166 : f32 to vector<8x512xf32>
    %171 = arith.addf %170, %169 : vector<8x512xf32>
    %cst_38 = arith.constant 0.666666686 : f32
    %172 = vector.broadcast %cst_38 : f32 to vector<8x512xf32>
    %173 = arith.mulf %172, %156 : vector<8x512xf32>
    %174 = arith.subf %171, %173 : vector<8x512xf32>
    %c0_39 = arith.constant 0 : index
    %175 = memref.load %arg1[%c0_39] : memref<21xf32, #tpu.memory_space<smem>>
    %176 = arith.mulf %0, %174 : vector<8x512xf32>
    %177 = vector.broadcast %175 : f32 to vector<8x512xf32>
    %178 = arith.addf %177, %176 : vector<8x512xf32>
    %cst_40 = arith.constant 5.000000e-01 : f32
    %179 = vector.broadcast %cst_40 : f32 to vector<8x512xf32>
    %180 = arith.mulf %179, %165 : vector<8x512xf32>
    %181 = arith.subf %178, %180 : vector<8x512xf32>
    %182 = arith.mulf %0, %0 : vector<8x512xf32>
    %cst_41 = arith.constant 1.000000e+00 : f32
    %183 = vector.broadcast %cst_41 : f32 to vector<8x512xf32>
    %184 = arith.subf %183, %182 : vector<8x512xf32>
    %185 = arith.mulf %181, %184 : vector<8x512xf32>
    %c0_42 = arith.constant 0 : index
    %c0_43 = arith.constant 0 : index
    %186 = vector.load %arg3[%c0_42, %c0_43] : memref<8x512xf32, #tpu.memory_space<vmem>>, vector<8x512xf32>
    tpu.vector_store %arg3[%c0_42, %c0_43], %185 {strides = array<i32>} : memref<8x512xf32, #tpu.memory_space<vmem>>, vector<8x512xf32>,
    return
  }
  func.func @transform_0(%arg0: i32) -> i32 {
    %c0_i32 = arith.constant 0 : i32
    %c0_i32_0 = arith.constant 0 : i32
    return %c0_i32 : i32
  }
  func.func @transform_1(%arg0: i32) -> (i32, i32) {
    %c0_i32 = arith.constant 0 : i32
    %c0_i32_0 = arith.constant 0 : i32
    return %arg0, %c0_i32 : i32, i32
  }
  func.func @transform_2(%arg0: i32) -> (i32, i32) {
    %c0_i32 = arith.constant 0 : i32
    %c0_i32_0 = arith.constant 0 : i32
    return %arg0, %c0_i32 : i32, i32
  }
}

</mosaic_0001>

<bundles_post_ra>
// kernel: tpu_custom_call.1
= control target key start
LH: loop header
LB: loop body
LE: loop exit
PB: predicated region body
PF: predicated region fallthrough
CT: control target
= control target key end

     0   :  { %7 = vsyncpa [#allocation5], 0  ;;  %s698_s0 = inlined_call_operand.hbm [shape: f32[21], index: 0, kind: input, shape index: {}]   ;;  %s699_s1 = inlined_call_operand.hbm [shape: f32[8,512], index: 1, kind: input, shape index: {}]   ;;  %s700_s2 = inlined_call_operand.hbm [shape: f32[8,512], index: 2, kind: output, shape index: {}]  }
   0x1   :  { %8 = vsyncpa [#allocation3], 0 }
   0x2   :  { %9 = vsyncpa [#allocation4], 0  ;;  %s575_s9 = smov [#allocation2]   ;;  %s576_s12 = smov [#allocation6]  }
   0x3   :  { %17 = dma.hbm_to_smem %s698_s0, 16, %s575_s9, [#allocation5]  }
   0x4   :  { %s24_s13 = sshll.u32 %s576_s12, 4  ;;  %s25_s13 = int_to_ptr.vmem [resolvable:$true] %s24_s13 }
   0x5   :  { %s537_s14 = scalar_lea.vmem %s25_s13, 512  ;;  %p542_p1 = scmp.lt.s32.totalorder %s25_s13, %s25_s13 }
   0x6   :  { %p538_p0 = scmp.ne.s32.totalorder %s25_s13, %s537_s14  ;;  %p543_p2 = scmp.lt.s32.totalorder %s537_s14, %s537_s14 }
   0x8   :  { %p544_p3 = por %p543_p2, %p542_p1 }
   0xa   :  { %p545_p4 = pnand %p544_p3, %p538_p0 }
   0xc   :  { %548 = shalt.err (!%p545_p4)
}
   0xd   :  { %27 = dma.hbm_to_vmem [thread:$0]  %s699_s1, 512, %s25_s13, [#allocation3]  }
   0xe   :  { %569 = dma.done.wait [#allocation5], 16  }
   0xf   :  { %570 = vsyncadd [#allocation5], 4294967280 }
  0x10   :  { %571 = dma.done.wait [#allocation3], 512  }
  0x11   :  { %572 = vsyncadd [#allocation3], 4294966784 }
  0x12   :  { %34 = sfence }
  0x13   :  { %s498_s0 = sld [smem:[#allocation2 + $0x14]]  ;;  %v599_v0 = vld [vmem:[#allocation6] sm:$0xff]  ;;  %v601_v1 = vld [vmem:[#allocation6 + $0x8] sm:$0xff]  ;;  %v603_v2 = vld [vmem:[#allocation6 + $0x10] sm:$0xff]  ;;  %s577_s8 = smov [#allocation7]  }
  0x14   :  { %s499_s17 = sld [smem:[#allocation2 + $0x13]]  ;;  %v605_v3 = vld [vmem:[#allocation6 + $0x18] sm:$0xff]  ;;  %s488_s9 = sshll.u32 %s577_s8, 4  ;;  %s489_s9 = int_to_ptr.vmem [resolvable:$true] %s488_s9 }
  0x15   :  { %s500_s18 = sld [smem:[#allocation2 + $0x12]]  ;;  %s549_s10 = scalar_lea.vmem %s489_s9, 512 }
  0x16   :  { %s501_s1 = sld [smem:[#allocation2 + $0x11]]  ;;  %p550_p5 = scmp.ne.s32.totalorder %s489_s9, %s549_s10 }
  0x17   :  { %s502_s19 = sld [smem:[#allocation2 + $0x10]]  ;;  %p554_p6 = scmp.lt.s32.totalorder %s489_s9, %s489_s9 }
  0x18   :  { %s503_s20 = sld [smem:[#allocation2 + $0xf]]  ;;  %p555_p7 = scmp.lt.s32.totalorder %s549_s10, %s549_s10 }
  0x19   :  { %v40_v4 = vstv %s498_s0  ;;  %s504_s21 = sld [smem:[#allocation2 + $0xe]] }
  0x1a   :  { %v42_v5 = vmul.f32 %v40_v4, %v599_v0  ;;  %v43_v6 = vmul.f32 %v40_v4, %v601_v1  ;;  %v44_v7 = vmul.f32 %v40_v4, %v603_v2  ;;  %v45_v8 = vmul.f32 %v40_v4, %v605_v3  ;;  %s505_s22 = sld [smem:[#allocation2 + $0xd]]  ;;  %p556_p8 = por %p555_p7, %p554_p6 }
  0x1b   :  { %v50_v9 = vstv %s499_s17  ;;  %v64_v22 = vstv %s500_s18  ;;  %v69_v23 = vmul.f32 0.95, %v40_v4  ;;  %s506_s23 = sld [smem:[#allocation2 + $0xc]] }
  0x1c   :  { %v46_v10 = vmul.f32 1.95, %v42_v5  ;;  %v47_v11 = vmul.f32 1.95, %v43_v6  ;;  %v48_v12 = vmul.f32 1.95, %v44_v7  ;;  %v83_v39 = vstv %s501_s1  ;;  %p557_p9 = pnand %p556_p8, %p550_p5 }
  0x1d   :  { %v49_v13 = vmul.f32 1.95, %v45_v8  ;;  %v105_v60 = vstv %s502_s19  ;;  %s507_s24 = sld [smem:[#allocation2 + $0xb]] }
  0x1e   :  { %v51_v14 = vadd.f32 %v50_v9, %v46_v10  ;;  %v52_v15 = vadd.f32 %v50_v9, %v47_v11  ;;  %v53_v16 = vadd.f32 %v50_v9, %v48_v12  ;;  %s508_s25 = sld [smem:[#allocation2 + $0xa]] }
  0x1f   :  { %v54_v17 = vadd.f32 %v50_v9, %v49_v13  ;;  %s509_s26 = sld [smem:[#allocation2 + $0x9]] }
  0x20   :  { %v56_v18 = vmul.f32 %v51_v14, %v599_v0  ;;  %v57_v19 = vmul.f32 %v52_v15, %v601_v1  ;;  %v58_v20 = vmul.f32 %v53_v16, %v603_v2  ;;  %v88_v41 = vmul.f32 0.94736844, %v51_v14  ;;  %s510_s27 = sld [smem:[#allocation2 + $0x8]] }
  0x21   :  { %v59_v21 = vmul.f32 %v54_v17, %v605_v3  ;;  %v89_v42 = vmul.f32 0.94736844, %v52_v15  ;;  %v90_v43 = vmul.f32 0.94736844, %v53_v16  ;;  %v91_v48 = vmul.f32 0.94736844, %v54_v17 }
  0x22   :  { %v60_v24 = vmul.f32 1.9473684, %v56_v18  ;;  %v61_v25 = vmul.f32 1.9473684, %v57_v19  ;;  %v62_v26 = vmul.f32 1.9473684, %v58_v20 }
  0x23   :  { %v63_v27 = vmul.f32 1.9473684, %v59_v21  ;;  %s511_s28 = sld [smem:[#allocation2 + $0x7]] }
  0x24   :  { %v65_v28 = vadd.f32 %v64_v22, %v60_v24  ;;  %v66_v29 = vadd.f32 %v64_v22, %v61_v25  ;;  %v67_v30 = vadd.f32 %v64_v22, %v62_v26  ;;  %s512_s29 = sld [smem:[#allocation2 + $0x6]] }
  0x25   :  { %v68_v31 = vadd.f32 %v64_v22, %v63_v27  ;;  %v127_v22 = vstv %s503_s20  ;;  %s513_s30 = sld [smem:[#allocation2 + $0x5]] }
  0x26   :  { %v70_v32 = vsub.f32 %v65_v28, %v69_v23  ;;  %v71_v33 = vsub.f32 %v66_v29, %v69_v23  ;;  %v72_v34 = vsub.f32 %v67_v30, %v69_v23  ;;  %s514_s3 = sld [smem:[#allocation2 + $0x4]] }
  0x27   :  { %v73_v35 = vsub.f32 %v68_v31, %v69_v23  ;;  %s515_s4 = sld [smem:[#allocation2 + $0x3]] }
  0x28   :  { %v75_v36 = vmul.f32 %v70_v32, %v599_v0  ;;  %v76_v37 = vmul.f32 %v71_v33, %v601_v1  ;;  %v77_v38 = vmul.f32 %v72_v34, %v603_v2  ;;  %v110_v62 = vmul.f32 0.9444444, %v70_v32  ;;  %s516_s5 = sld [smem:[#allocation2 + $0x2]] }
  0x29   :  { %v78_v40 = vmul.f32 %v73_v35, %v605_v3  ;;  %v111_v63 = vmul.f32 0.9444444, %v71_v33  ;;  %v112_v4 = vmul.f32 0.9444444, %v72_v34  ;;  %v113_v9 = vmul.f32 0.9444444, %v73_v35 }
  0x2a   :  { %v79_v44 = vmul.f32 1.9444444, %v75_v36  ;;  %v80_v45 = vmul.f32 1.9444444, %v76_v37  ;;  %v81_v46 = vmul.f32 1.9444444, %v77_v38 }
  0x2b   :  { %v82_v47 = vmul.f32 1.9444444, %v78_v40  ;;  %s517_s6 = sld [smem:[#allocation2 + $0x1]] }
  0x2c   :  { %v84_v49 = vadd.f32 %v83_v39, %v79_v44  ;;  %v85_v50 = vadd.f32 %v83_v39, %v80_v45  ;;  %v86_v51 = vadd.f32 %v83_v39, %v81_v46  ;;  %s448_s7 = sld [smem:[#allocation2]] }
  0x2d   :  { %v87_v52 = vadd.f32 %v83_v39, %v82_v47 }
  0x2e   :  { %v92_v53 = vsub.f32 %v84_v49, %v88_v41  ;;  %v93_v54 = vsub.f32 %v85_v50, %v89_v42  ;;  %v94_v55 = vsub.f32 %v86_v51, %v90_v43  ;;  %v149_v42 = vstv %s504_s21 }
  0x2f   :  { %v95_v56 = vsub.f32 %v87_v52, %v91_v48 }
  0x30   :  { %v97_v57 = vmul.f32 %v92_v53, %v599_v0  ;;  %v98_v58 = vmul.f32 %v93_v54, %v601_v1  ;;  %v99_v59 = vmul.f32 %v94_v55, %v603_v2  ;;  %v132_v23 = vmul.f32 0.9411765, %v92_v53 }
  0x31   :  { %v100_v61 = vmul.f32 %v95_v56, %v605_v3  ;;  %v133_v24 = vmul.f32 0.9411765, %v93_v54  ;;  %v134_v28 = vmul.f32 0.9411765, %v94_v55  ;;  %v135_v30 = vmul.f32 0.9411765, %v95_v56 }
  0x32   :  { %v101_v5 = vmul.f32 1.9411764, %v97_v57  ;;  %v102_v6 = vmul.f32 1.9411764, %v98_v58  ;;  %v103_v7 = vmul.f32 1.9411764, %v99_v59 }
  0x33   :  { %v104_v8 = vmul.f32 1.9411764, %v100_v61 }
  0x34   :  { %v106_v10 = vadd.f32 %v105_v60, %v101_v5  ;;  %v107_v11 = vadd.f32 %v105_v60, %v102_v6  ;;  %v108_v12 = vadd.f32 %v105_v60, %v103_v7 }
  0x35   :  { %v109_v13 = vadd.f32 %v105_v60, %v104_v8 }
  0x36   :  { %v114_v14 = vsub.f32 %v106_v10, %v110_v62  ;;  %v115_v15 = vsub.f32 %v107_v11, %v111_v63  ;;  %v116_v16 = vsub.f32 %v108_v12, %v112_v4  ;;  %v171_v63 = vstv %s505_s22 }
  0x37   :  { %v117_v17 = vsub.f32 %v109_v13, %v113_v9 }
  0x38   :  { %v119_v18 = vmul.f32 %v114_v14, %v599_v0  ;;  %v120_v19 = vmul.f32 %v115_v15, %v601_v1  ;;  %v121_v20 = vmul.f32 %v116_v16, %v603_v2  ;;  %v154_v44 = vmul.f32 0.9375, %v114_v14 }
  0x39   :  { %v122_v21 = vmul.f32 %v117_v17, %v605_v3  ;;  %v155_v45 = vmul.f32 0.9375, %v115_v15  ;;  %v156_v46 = vmul.f32 0.9375, %v116_v16  ;;  %v157_v51 = vmul.f32 0.9375, %v117_v17 }
  0x3a   :  { %v123_v25 = vmul.f32 1.9375, %v119_v18  ;;  %v124_v26 = vmul.f32 1.9375, %v120_v19  ;;  %v125_v27 = vmul.f32 1.9375, %v121_v20 }
  0x3b   :  { %v126_v29 = vmul.f32 1.9375, %v122_v21 }
  0x3c   :  { %v128_v31 = vadd.f32 %v127_v22, %v123_v25  ;;  %v129_v32 = vadd.f32 %v127_v22, %v124_v26  ;;  %v130_v33 = vadd.f32 %v127_v22, %v125_v27 }
  0x3d   :  { %v131_v34 = vadd.f32 %v127_v22, %v126_v29 }
  0x3e   :  { %v136_v35 = vsub.f32 %v128_v31, %v132_v23  ;;  %v137_v36 = vsub.f32 %v129_v32, %v133_v24  ;;  %v138_v37 = vsub.f32 %v130_v33, %v134_v28  ;;  %v193_v24 = vstv %s506_s23 }
  0x3f   :  { %v139_v38 = vsub.f32 %v131_v34, %v135_v30 }
  0x40   :  { %v141_v39 = vmul.f32 %v136_v35, %v599_v0  ;;  %v142_v40 = vmul.f32 %v137_v36, %v601_v1  ;;  %v143_v41 = vmul.f32 %v138_v37, %v603_v2  ;;  %v176_v5 = vmul.f32 0.93333334, %v136_v35 }
  0x41   :  { %v144_v43 = vmul.f32 %v139_v38, %v605_v3  ;;  %v177_v6 = vmul.f32 0.93333334, %v137_v36  ;;  %v178_v7 = vmul.f32 0.93333334, %v138_v37  ;;  %v179_v12 = vmul.f32 0.93333334, %v139_v38 }
  0x42   :  { %v145_v47 = vmul.f32 1.9333333, %v141_v39  ;;  %v146_v48 = vmul.f32 1.9333333, %v142_v40  ;;  %v147_v49 = vmul.f32 1.9333333, %v143_v41 }
  0x43   :  { %v148_v50 = vmul.f32 1.9333333, %v144_v43 }
  0x44   :  { %v150_v52 = vadd.f32 %v149_v42, %v145_v47  ;;  %v151_v53 = vadd.f32 %v149_v42, %v146_v48  ;;  %v152_v54 = vadd.f32 %v149_v42, %v147_v49 }
  0x45   :  { %v153_v55 = vadd.f32 %v149_v42, %v148_v50 }
  0x46   :  { %v158_v56 = vsub.f32 %v150_v52, %v154_v44  ;;  %v159_v57 = vsub.f32 %v151_v53, %v155_v45  ;;  %v160_v58 = vsub.f32 %v152_v54, %v156_v46  ;;  %v215_v45 = vstv %s507_s24 }
  0x47   :  { %v161_v59 = vsub.f32 %v153_v55, %v157_v51 }
  0x48   :  { %v163_v60 = vmul.f32 %v158_v56, %v599_v0  ;;  %v164_v61 = vmul.f32 %v159_v57, %v601_v1  ;;  %v165_v62 = vmul.f32 %v160_v58, %v603_v2  ;;  %v198_v26 = vmul.f32 0.9285714, %v158_v56 }
  0x49   :  { %v166_v4 = vmul.f32 %v161_v59, %v605_v3  ;;  %v199_v27 = vmul.f32 0.9285714, %v159_v57  ;;  %v200_v28 = vmul.f32 0.9285714, %v160_v58  ;;  %v201_v33 = vmul.f32 0.9285714, %v161_v59 }
  0x4a   :  { %v167_v8 = vmul.f32 1.9285715, %v163_v60  ;;  %v168_v9 = vmul.f32 1.9285715, %v164_v61  ;;  %v169_v10 = vmul.f32 1.9285715, %v165_v62 }
  0x4b   :  { %v170_v11 = vmul.f32 1.9285715, %v166_v4 }
  0x4c   :  { %v172_v13 = vadd.f32 %v171_v63, %v167_v8  ;;  %v173_v14 = vadd.f32 %v171_v63, %v168_v9  ;;  %v174_v15 = vadd.f32 %v171_v63, %v169_v10 }
  0x4d   :  { %v175_v16 = vadd.f32 %v171_v63, %v170_v11 }
  0x4e   :  { %v180_v17 = vsub.f32 %v172_v13, %v176_v5  ;;  %v181_v18 = vsub.f32 %v173_v14, %v177_v6  ;;  %v182_v19 = vsub.f32 %v174_v15, %v178_v7  ;;  %v237_v6 = vstv %s508_s25 }
  0x4f   :  { %v183_v20 = vsub.f32 %v175_v16, %v179_v12 }
  0x50   :  { %v185_v21 = vmul.f32 %v180_v17, %v599_v0  ;;  %v186_v22 = vmul.f32 %v181_v18, %v601_v1  ;;  %v187_v23 = vmul.f32 %v182_v19, %v603_v2  ;;  %v220_v47 = vmul.f32 0.9230769, %v180_v17 }
  0x51   :  { %v188_v25 = vmul.f32 %v183_v20, %v605_v3  ;;  %v221_v48 = vmul.f32 0.9230769, %v181_v18  ;;  %v222_v49 = vmul.f32 0.9230769, %v182_v19  ;;  %v223_v54 = vmul.f32 0.9230769, %v183_v20 }
  0x52   :  { %v189_v29 = vmul.f32 1.9230769, %v185_v21  ;;  %v190_v30 = vmul.f32 1.9230769, %v186_v22  ;;  %v191_v31 = vmul.f32 1.9230769, %v187_v23 }
  0x53   :  { %v192_v32 = vmul.f32 1.9230769, %v188_v25 }
  0x54   :  { %v194_v34 = vadd.f32 %v193_v24, %v189_v29  ;;  %v195_v35 = vadd.f32 %v193_v24, %v190_v30  ;;  %v196_v36 = vadd.f32 %v193_v24, %v191_v31 }
  0x55   :  { %v197_v37 = vadd.f32 %v193_v24, %v192_v32 }
  0x56   :  { %v202_v38 = vsub.f32 %v194_v34, %v198_v26  ;;  %v203_v39 = vsub.f32 %v195_v35, %v199_v27  ;;  %v204_v40 = vsub.f32 %v196_v36, %v200_v28  ;;  %v259_v27 = vstv %s509_s26 }
  0x57   :  { %v205_v41 = vsub.f32 %v197_v37, %v201_v33 }
  0x58   :  { %v207_v42 = vmul.f32 %v202_v38, %v599_v0  ;;  %v208_v43 = vmul.f32 %v203_v39, %v601_v1  ;;  %v209_v44 = vmul.f32 %v204_v40, %v603_v2  ;;  %v242_v8 = vmul.f32 0.9166667, %v202_v38 }
  0x59   :  { %v210_v46 = vmul.f32 %v205_v41, %v605_v3  ;;  %v243_v9 = vmul.f32 0.9166667, %v203_v39  ;;  %v244_v10 = vmul.f32 0.9166667, %v204_v40  ;;  %v245_v15 = vmul.f32 0.9166667, %v205_v41 }
  0x5a   :  { %v211_v50 = vmul.f32 1.9166666, %v207_v42  ;;  %v212_v51 = vmul.f32 1.9166666, %v208_v43  ;;  %v213_v52 = vmul.f32 1.9166666, %v209_v44 }
  0x5b   :  { %v214_v53 = vmul.f32 1.9166666, %v210_v46 }
  0x5c   :  { %v216_v55 = vadd.f32 %v215_v45, %v211_v50  ;;  %v217_v56 = vadd.f32 %v215_v45, %v212_v51  ;;  %v218_v57 = vadd.f32 %v215_v45, %v213_v52 }
  0x5d   :  { %v219_v58 = vadd.f32 %v215_v45, %v214_v53 }
  0x5e   :  { %v224_v59 = vsub.f32 %v216_v55, %v220_v47  ;;  %v225_v60 = vsub.f32 %v217_v56, %v221_v48  ;;  %v226_v61 = vsub.f32 %v218_v57, %v222_v49  ;;  %v281_v48 = vstv %s510_s27 }
  0x5f   :  { %v227_v62 = vsub.f32 %v219_v58, %v223_v54 }
  0x60   :  { %v229_v63 = vmul.f32 %v224_v59, %v599_v0  ;;  %v230_v4 = vmul.f32 %v225_v60, %v601_v1  ;;  %v231_v5 = vmul.f32 %v226_v61, %v603_v2  ;;  %v264_v29 = vmul.f32 0.90909094, %v224_v59 }
  0x61   :  { %v232_v7 = vmul.f32 %v227_v62, %v605_v3  ;;  %v265_v30 = vmul.f32 0.90909094, %v225_v60  ;;  %v266_v31 = vmul.f32 0.90909094, %v226_v61  ;;  %v267_v36 = vmul.f32 0.90909094, %v227_v62 }
  0x62   :  { %v233_v11 = vmul.f32 1.9090909, %v229_v63  ;;  %v234_v12 = vmul.f32 1.9090909, %v230_v4  ;;  %v235_v13 = vmul.f32 1.9090909, %v231_v5 }
  0x63   :  { %v236_v14 = vmul.f32 1.9090909, %v232_v7 }
  0x64   :  { %v238_v16 = vadd.f32 %v237_v6, %v233_v11  ;;  %v239_v17 = vadd.f32 %v237_v6, %v234_v12  ;;  %v240_v18 = vadd.f32 %v237_v6, %v235_v13 }
  0x65   :  { %v241_v19 = vadd.f32 %v237_v6, %v236_v14 }
  0x66   :  { %v246_v20 = vsub.f32 %v238_v16, %v242_v8  ;;  %v247_v21 = vsub.f32 %v239_v17, %v243_v9  ;;  %v248_v22 = vsub.f32 %v240_v18, %v244_v10  ;;  %v303_v10 = vstv %s511_s28 }
  0x67   :  { %v249_v23 = vsub.f32 %v241_v19, %v245_v15 }
  0x68   :  { %v251_v24 = vmul.f32 %v246_v20, %v599_v0  ;;  %v252_v25 = vmul.f32 %v247_v21, %v601_v1  ;;  %v253_v26 = vmul.f32 %v248_v22, %v603_v2  ;;  %v286_v50 = vmul.f32 0.9, %v246_v20 }
  0x69   :  { %v254_v28 = vmul.f32 %v249_v23, %v605_v3  ;;  %v287_v51 = vmul.f32 0.9, %v247_v21  ;;  %v288_v52 = vmul.f32 0.9, %v248_v22  ;;  %v289_v57 = vmul.f32 0.9, %v249_v23 }
  0x6a   :  { %v255_v32 = vmul.f32 1.9, %v251_v24  ;;  %v256_v33 = vmul.f32 1.9, %v252_v25  ;;  %v257_v34 = vmul.f32 1.9, %v253_v26 }
  0x6b   :  { %v258_v35 = vmul.f32 1.9, %v254_v28 }
  0x6c   :  { %v260_v37 = vadd.f32 %v259_v27, %v255_v32  ;;  %v261_v38 = vadd.f32 %v259_v27, %v256_v33  ;;  %v262_v39 = vadd.f32 %v259_v27, %v257_v34 }
  0x6d   :  { %v263_v40 = vadd.f32 %v259_v27, %v258_v35 }
  0x6e   :  { %v268_v41 = vsub.f32 %v260_v37, %v264_v29  ;;  %v269_v42 = vsub.f32 %v261_v38, %v265_v30  ;;  %v270_v43 = vsub.f32 %v262_v39, %v266_v31  ;;  %v325_v30 = vstv %s512_s29 }
  0x6f   :  { %v271_v44 = vsub.f32 %v263_v40, %v267_v36 }
  0x70   :  { %v273_v45 = vmul.f32 %v268_v41, %v599_v0  ;;  %v274_v46 = vmul.f32 %v269_v42, %v601_v1  ;;  %v275_v47 = vmul.f32 %v270_v43, %v603_v2  ;;  %v308_v11 = vmul.f32 0.8888889, %v268_v41 }
  0x71   :  { %v276_v49 = vmul.f32 %v271_v44, %v605_v3  ;;  %v309_v12 = vmul.f32 0.8888889, %v269_v42  ;;  %v310_v16 = vmul.f32 0.8888889, %v270_v43  ;;  %v311_v18 = vmul.f32 0.8888889, %v271_v44 }
  0x72   :  { %v277_v53 = vmul.f32 1.8888888, %v273_v45  ;;  %v278_v54 = vmul.f32 1.8888888, %v274_v46  ;;  %v279_v55 = vmul.f32 1.8888888, %v275_v47 }
  0x73   :  { %v280_v56 = vmul.f32 1.8888888, %v276_v49 }
  0x74   :  { %v282_v58 = vadd.f32 %v281_v48, %v277_v53  ;;  %v283_v59 = vadd.f32 %v281_v48, %v278_v54  ;;  %v284_v60 = vadd.f32 %v281_v48, %v279_v55 }
  0x75   :  { %v285_v61 = vadd.f32 %v281_v48, %v280_v56 }
  0x76   :  { %v290_v62 = vsub.f32 %v282_v58, %v286_v50  ;;  %v291_v63 = vsub.f32 %v283_v59, %v287_v51  ;;  %v292_v4 = vsub.f32 %v284_v60, %v288_v52  ;;  %v347_v51 = vstv %s513_s30 }
  0x77   :  { %v293_v5 = vsub.f32 %v285_v61, %v289_v57 }
  0x78   :  { %v295_v6 = vmul.f32 %v290_v62, %v599_v0  ;;  %v296_v7 = vmul.f32 %v291_v63, %v601_v1  ;;  %v297_v8 = vmul.f32 %v292_v4, %v603_v2  ;;  %v330_v32 = vmul.f32 0.875, %v290_v62 }
  0x79   :  { %v298_v9 = vmul.f32 %v293_v5, %v605_v3  ;;  %v331_v33 = vmul.f32 0.875, %v291_v63  ;;  %v332_v34 = vmul.f32 0.875, %v292_v4  ;;  %v333_v39 = vmul.f32 0.875, %v293_v5 }
  0x7a   :  { %v299_v13 = vmul.f32 1.875, %v295_v6  ;;  %v300_v14 = vmul.f32 1.875, %v296_v7  ;;  %v301_v15 = vmul.f32 1.875, %v297_v8 }
  0x7b   :  { %v302_v17 = vmul.f32 1.875, %v298_v9 }
  0x7c   :  { %v304_v19 = vadd.f32 %v303_v10, %v299_v13  ;;  %v305_v20 = vadd.f32 %v303_v10, %v300_v14  ;;  %v306_v21 = vadd.f32 %v303_v10, %v301_v15 }
  0x7d   :  { %v307_v22 = vadd.f32 %v303_v10, %v302_v17 }
  0x7e   :  { %v312_v23 = vsub.f32 %v304_v19, %v308_v11  ;;  %v313_v24 = vsub.f32 %v305_v20, %v309_v12  ;;  %v314_v25 = vsub.f32 %v306_v21, %v310_v16  ;;  %v369_v12 = vstv %s514_s3 }
  0x7f   :  { %v315_v26 = vsub.f32 %v307_v22, %v311_v18 }
  0x80   :  { %v317_v27 = vmul.f32 %v312_v23, %v599_v0  ;;  %v318_v28 = vmul.f32 %v313_v24, %v601_v1  ;;  %v319_v29 = vmul.f32 %v314_v25, %v603_v2  ;;  %v352_v53 = vmul.f32 0.85714287, %v312_v23 }
  0x81   :  { %v320_v31 = vmul.f32 %v315_v26, %v605_v3  ;;  %v353_v54 = vmul.f32 0.85714287, %v313_v24  ;;  %v354_v55 = vmul.f32 0.85714287, %v314_v25  ;;  %v355_v60 = vmul.f32 0.85714287, %v315_v26 }
  0x82   :  { %v321_v35 = vmul.f32 1.8571428, %v317_v27  ;;  %v322_v36 = vmul.f32 1.8571428, %v318_v28  ;;  %v323_v37 = vmul.f32 1.8571428, %v319_v29 }
  0x83   :  { %v324_v38 = vmul.f32 1.8571428, %v320_v31 }
  0x84   :  { %v326_v40 = vadd.f32 %v325_v30, %v321_v35  ;;  %v327_v41 = vadd.f32 %v325_v30, %v322_v36  ;;  %v328_v42 = vadd.f32 %v325_v30, %v323_v37 }
  0x85   :  { %v329_v43 = vadd.f32 %v325_v30, %v324_v38 }
  0x86   :  { %v334_v44 = vsub.f32 %v326_v40, %v330_v32  ;;  %v335_v45 = vsub.f32 %v327_v41, %v331_v33  ;;  %v336_v46 = vsub.f32 %v328_v42, %v332_v34  ;;  %v391_v34 = vstv %s515_s4 }
  0x87   :  { %v337_v47 = vsub.f32 %v329_v43, %v333_v39 }
  0x88   :  { %v339_v48 = vmul.f32 %v334_v44, %v599_v0  ;;  %v340_v49 = vmul.f32 %v335_v45, %v601_v1  ;;  %v341_v50 = vmul.f32 %v336_v46, %v603_v2  ;;  %v374_v14 = vmul.f32 0.8333333, %v334_v44 }
  0x89   :  { %v342_v52 = vmul.f32 %v337_v47, %v605_v3  ;;  %v375_v15 = vmul.f32 0.8333333, %v335_v45  ;;  %v376_v16 = vmul.f32 0.8333333, %v336_v46  ;;  %v377_v21 = vmul.f32 0.8333333, %v337_v47 }
  0x8a   :  { %v343_v56 = vmul.f32 1.8333334, %v339_v48  ;;  %v344_v57 = vmul.f32 1.8333334, %v340_v49  ;;  %v345_v58 = vmul.f32 1.8333334, %v341_v50 }
  0x8b   :  { %v346_v59 = vmul.f32 1.8333334, %v342_v52 }
  0x8c   :  { %v348_v61 = vadd.f32 %v347_v51, %v343_v56  ;;  %v349_v62 = vadd.f32 %v347_v51, %v344_v57  ;;  %v350_v63 = vadd.f32 %v347_v51, %v345_v58 }
  0x8d   :  { %v351_v4 = vadd.f32 %v347_v51, %v346_v59 }
  0x8e   :  { %v356_v5 = vsub.f32 %v348_v61, %v352_v53  ;;  %v357_v6 = vsub.f32 %v349_v62, %v353_v54  ;;  %v358_v7 = vsub.f32 %v350_v63, %v354_v55  ;;  %v413_v54 = vstv %s516_s5 }
  0x8f   :  { %v359_v8 = vsub.f32 %v351_v4, %v355_v60 }
  0x90   :  { %v361_v9 = vmul.f32 %v356_v5, %v599_v0  ;;  %v362_v10 = vmul.f32 %v357_v6, %v601_v1  ;;  %v363_v11 = vmul.f32 %v358_v7, %v603_v2  ;;  %v396_v35 = vmul.f32 0.8, %v356_v5 }
  0x91   :  { %v364_v13 = vmul.f32 %v359_v8, %v605_v3  ;;  %v397_v36 = vmul.f32 0.8, %v357_v6  ;;  %v398_v40 = vmul.f32 0.8, %v358_v7  ;;  %v399_v42 = vmul.f32 0.8, %v359_v8 }
  0x92   :  { %v365_v17 = vmul.f32 1.8, %v361_v9  ;;  %v366_v18 = vmul.f32 1.8, %v362_v10  ;;  %v367_v19 = vmul.f32 1.8, %v363_v11 }
  0x93   :  { %v368_v20 = vmul.f32 1.8, %v364_v13 }
  0x94   :  { %v370_v22 = vadd.f32 %v369_v12, %v365_v17  ;;  %v371_v23 = vadd.f32 %v369_v12, %v366_v18  ;;  %v372_v24 = vadd.f32 %v369_v12, %v367_v19 }
  0x95   :  { %v373_v25 = vadd.f32 %v369_v12, %v368_v20 }
  0x96   :  { %v378_v26 = vsub.f32 %v370_v22, %v374_v14  ;;  %v379_v27 = vsub.f32 %v371_v23, %v375_v15  ;;  %v380_v28 = vsub.f32 %v372_v24, %v376_v16  ;;  %v435_v16 = vstv %s517_s6 }
  0x97   :  { %v381_v29 = vsub.f32 %v373_v25, %v377_v21 }
  0x98   :  { %v383_v30 = vmul.f32 %v378_v26, %v599_v0  ;;  %v384_v31 = vmul.f32 %v379_v27, %v601_v1  ;;  %v385_v32 = vmul.f32 %v380_v28, %v603_v2  ;;  %v418_v56 = vmul.f32 0.75, %v378_v26 }
  0x99   :  { %v386_v33 = vmul.f32 %v381_v29, %v605_v3  ;;  %v419_v57 = vmul.f32 0.75, %v379_v27  ;;  %v420_v58 = vmul.f32 0.75, %v380_v28  ;;  %v421_v63 = vmul.f32 0.75, %v381_v29 }
  0x9a   :  { %v387_v37 = vmul.f32 1.75, %v383_v30  ;;  %v388_v38 = vmul.f32 1.75, %v384_v31  ;;  %v389_v39 = vmul.f32 1.75, %v385_v32  ;;  %v453_v29 = vstv %s448_s7 }
  0x9b   :  { %v390_v41 = vmul.f32 1.75, %v386_v33  ;;  %v466_v30 = vmul.f32 %v599_v0, %v599_v0  ;;  %v467_v31 = vmul.f32 %v601_v1, %v601_v1 }
  0x9c   :  { %v392_v43 = vadd.f32 %v391_v34, %v387_v37  ;;  %v393_v44 = vadd.f32 %v391_v34, %v388_v38  ;;  %v394_v45 = vadd.f32 %v391_v34, %v389_v39  ;;  %v469_v39 = vmul.f32 %v605_v3, %v605_v3 }
  0x9d   :  { %v395_v46 = vadd.f32 %v391_v34, %v390_v41 }
  0x9e   :  { %v400_v47 = vsub.f32 %v392_v43, %v396_v35  ;;  %v401_v48 = vsub.f32 %v393_v44, %v397_v36  ;;  %v402_v49 = vsub.f32 %v394_v45, %v398_v40  ;;  %v468_v35 = vmul.f32 %v603_v2, %v603_v2 }
  0x9f   :  { %v403_v50 = vsub.f32 %v395_v46, %v399_v42  ;;  %v470_v46 = vsub.f32 1.0, %v466_v30 }
  0xa0   :  { %v405_v51 = vmul.f32 %v400_v47, %v599_v0  ;;  %v406_v52 = vmul.f32 %v401_v48, %v601_v1  ;;  %v407_v53 = vmul.f32 %v402_v49, %v603_v2  ;;  %v440_v17 = vmul.f32 0.6666667, %v400_v47 }
  0xa1   :  { %v408_v55 = vmul.f32 %v403_v50, %v605_v3  ;;  %v441_v18 = vmul.f32 0.6666667, %v401_v48  ;;  %v442_v22 = vmul.f32 0.6666667, %v402_v49  ;;  %v443_v24 = vmul.f32 0.6666667, %v403_v50 }
  0xa2   :  { %v409_v59 = vmul.f32 1.6666666, %v405_v51  ;;  %v410_v60 = vmul.f32 1.6666666, %v406_v52  ;;  %v411_v61 = vmul.f32 1.6666666, %v407_v53 }
  0xa3   :  { %v412_v62 = vmul.f32 1.6666666, %v408_v55  ;;  %v471_v47 = vsub.f32 1.0, %v467_v31  ;;  %v472_v51 = vsub.f32 1.0, %v468_v35  ;;  %v473_v53 = vsub.f32 1.0, %v469_v39 }
  0xa4   :  { %v414_v4 = vadd.f32 %v413_v54, %v409_v59  ;;  %v415_v5 = vadd.f32 %v413_v54, %v410_v60  ;;  %v416_v6 = vadd.f32 %v413_v54, %v411_v61 }
  0xa5   :  { %v417_v7 = vadd.f32 %v413_v54, %v412_v62 }
  0xa6   :  { %v422_v8 = vsub.f32 %v414_v4, %v418_v56  ;;  %v423_v9 = vsub.f32 %v415_v5, %v419_v57  ;;  %v424_v10 = vsub.f32 %v416_v6, %v420_v58 }
  0xa7   :  { %v425_v11 = vsub.f32 %v417_v7, %v421_v63 }
  0xa8   :  { %v427_v12 = vmul.f32 %v422_v8, %v599_v0  ;;  %v428_v13 = vmul.f32 %v423_v9, %v601_v1  ;;  %v429_v14 = vmul.f32 %v424_v10, %v603_v2  ;;  %v458_v37 = vmul.f32 0.5, %v422_v8 }
  0xa9   :  { %v430_v15 = vmul.f32 %v425_v11, %v605_v3  ;;  %v459_v38 = vmul.f32 0.5, %v423_v9  ;;  %v460_v43 = vmul.f32 0.5, %v424_v10  ;;  %v461_v45 = vmul.f32 0.5, %v425_v11 }
  0xaa   :  { %v431_v19 = vmul.f32 1.5, %v427_v12  ;;  %v432_v20 = vmul.f32 1.5, %v428_v13  ;;  %v433_v21 = vmul.f32 1.5, %v429_v14 }
  0xab   :  { %v434_v23 = vmul.f32 1.5, %v430_v15 }
  0xac   :  { %v436_v25 = vadd.f32 %v435_v16, %v431_v19  ;;  %v437_v26 = vadd.f32 %v435_v16, %v432_v20  ;;  %v438_v27 = vadd.f32 %v435_v16, %v433_v21 }
  0xad   :  { %v439_v28 = vadd.f32 %v435_v16, %v434_v23 }
  0xae   :  { %v444_v32 = vsub.f32 %v436_v25, %v440_v17  ;;  %v445_v33 = vsub.f32 %v437_v26, %v441_v18  ;;  %v446_v34 = vsub.f32 %v438_v27, %v442_v22 }
  0xaf   :  { %v447_v36 = vsub.f32 %v439_v28, %v443_v24 }
  0xb0   :  { %v449_v40 = vmul.f32 %v444_v32, %v599_v0  ;;  %v450_v41 = vmul.f32 %v445_v33, %v601_v1  ;;  %v451_v42 = vmul.f32 %v446_v34, %v603_v2 }
  0xb1   :  { %v452_v44 = vmul.f32 %v447_v36, %v605_v3 }
  0xb2   :  { %v454_v48 = vadd.f32 %v453_v29, %v449_v40  ;;  %v455_v49 = vadd.f32 %v453_v29, %v450_v41  ;;  %v456_v50 = vadd.f32 %v453_v29, %v451_v42 }
  0xb3   :  { %v457_v52 = vadd.f32 %v453_v29, %v452_v44 }
  0xb4   :  { %v462_v54 = vsub.f32 %v454_v48, %v458_v37  ;;  %v463_v55 = vsub.f32 %v455_v49, %v459_v38  ;;  %v464_v56 = vsub.f32 %v456_v50, %v460_v43 }
  0xb5   :  { %v465_v0 = vsub.f32 %v457_v52, %v461_v45 }
  0xb6   :  { %v474_v1 = vmul.f32 %v470_v46, %v462_v54  ;;  %v475_v2 = vmul.f32 %v471_v47, %v463_v55  ;;  %v476_v57 = vmul.f32 %v472_v51, %v464_v56 }
  0xb7   :  { %v477_v58 = vmul.f32 %v473_v53, %v465_v0 }
  0xb8   :  { %478 = vst [vmem:[#allocation7] sm:$0xff] %v474_v1  ;;  %479 = vst [vmem:[#allocation7 + $0x8] sm:$0xff] %v475_v2 }
  0xb9   :  { %480 = vst [vmem:[#allocation7 + $0x10] sm:$0xff] %v476_v57  ;;  %481 = vst [vmem:[#allocation7 + $0x18] sm:$0xff] %v477_v58 }
  0xba   :  { %560 = shalt.err (!%p557_p9)
}
  0xbb   :  { %491 = dma.vmem_to_hbm [thread:$0]  %s489_s9, 512, %s700_s2, [#allocation4]  }
  0xbc   :  { %573 = dma.done.wait [#allocation4], 512  }
  0xbd   :  { %574 = vsyncadd [#allocation4], 4294966784 }
  0xbe   :  { %495 = vsyncpa [#allocation3], 1 }
  0xbf   :  { %496 = vsyncpa [#allocation4], 1 }
  0xc0   :  { %497 = vsyncpa [#allocation5], 1 }

</bundles_post_ra>
